<compile_context>
chip_gen: v7x
topology: tpu7x:2x2x1
jax: 0.10.0
libtpu: 0.0.40
codegen_flags: <defaults>
</compile_context>

<pallas_src>
import functools

import jax
import jax.numpy as jnp
from jax.experimental import pallas as pl
from jax.experimental.pallas import tpu as pltpu

_LANE = 128
_SUBLANE = 8


def _round_up(n, m):
    return (n + m - 1) // m * m


# ---------------------------------------------------------------------------
# Kernel: one (tm, d_pad) row tile of
#   hidden = relu(x @ W_h + b_h)        with  W_h = [Ws | Wp], b_h = [bs | bp]
#   out    = hidden @ Wm + bm
# Both matmuls accumulate in f32 on the MXU.
# ---------------------------------------------------------------------------
def _transfer_kernel(x_ref, wh_ref, bh_ref, wm_ref, bm_ref, o_ref):
    x = x_ref[...]
    hidden = jnp.dot(x, wh_ref[...], preferred_element_type=jnp.float32)
    hidden = jnp.maximum(hidden + bh_ref[...], 0.0)
    out = jnp.dot(hidden.astype(wm_ref.dtype), wm_ref[...],
                  preferred_element_type=jnp.float32)
    o_ref[...] = (out + bm_ref[...]).astype(o_ref.dtype)


@functools.lru_cache(maxsize=None)
def _vmem_capacity_bytes():
    """Per-core VMEM capacity; conservative (v7x) fallback if query fails."""
    try:
        cap = getattr(pltpu.get_tpu_info(), "vmem_capacity_bytes", None)
        if cap:
            return int(cap)
    except Exception:
        pass
    return 64 * 1024 * 1024


@functools.lru_cache(maxsize=None)
def _single_buffered_weights_supported():
    """One-time probe: does pipeline_mode=pl.Buffered(1) lower & run here?"""
    if not hasattr(pl, "Buffered"):
        return False
    try:
        def _copy(x_ref, o_ref):
            o_ref[...] = x_ref[...]

        probe = pl.pallas_call(
            _copy,
            out_shape=jax.ShapeDtypeStruct((_SUBLANE, _LANE), jnp.float32),
            grid=(1,),
            in_specs=[pl.BlockSpec((_SUBLANE, _LANE), lambda i: (0, 0),
                                   pipeline_mode=pl.Buffered(1))],
            out_specs=pl.BlockSpec((_SUBLANE, _LANE), lambda i: (0, 0)),
        )
        jax.block_until_ready(probe(jnp.zeros((_SUBLANE, _LANE), jnp.float32)))
        return True
    except Exception:
        return False


def _pick_tm(M, per_row_bytes, resident_bytes, budget):
    """Row tile size: single step for tiny M, otherwise ~256-row tiles with an
    even step count (pipelining + balanced split across v7x's 2 TensorCores)."""
    if M < 128:
        tm = _round_up(max(M, 1), _SUBLANE)
    else:
        n_steps = max(2, pl.cdiv(M, 256))
        n_steps = _round_up(n_steps, 2)          # even -> no 2-core imbalance
        tm = _round_up(pl.cdiv(M, n_steps), _SUBLANE)
    while tm > _SUBLANE and resident_bytes + tm * per_row_bytes > budget:
        tm = max(_SUBLANE, _round_up(tm // 2, _SUBLANE))
    return tm


def cross_domain_transfer(x, ws, bs, wp, bp, wm, bm, *, tm=None):
    """Forward pass of CrossDomainTransfer.

    x:  (B, T, D)
    ws: (D, shared_dim),   bs: (1, shared_dim)
    wp: (D, private_dim),  bp: (1, private_dim)
    wm: (shared_dim + private_dim, D), bm: (1, D)
    """
    B, T, D = x.shape
    M = B * T
    shared_dim = ws.shape[1]
    private_dim = wp.shape[1]
    H = shared_dim + private_dim
    assert wm.shape == (H, D)

    d_pad = _round_up(D, _LANE)
    h_pad = _round_up(H, _LANE)
    x_itemsize = x.dtype.itemsize
    w_itemsize = ws.dtype.itemsize

    single_buffer = _single_buffered_weights_supported()
    buf_factor = 1 if single_buffer else 2
    # Resident weights/biases (W_h, b_h, Wm, bm), times their buffer count.
    resident_bytes = buf_factor * w_itemsize * (
        d_pad * h_pad + h_pad + h_pad * d_pad + d_pad)
    # Per-row VMEM: double-buffered x and out tiles + the f32 hidden
    # activations and f32 pre-cast output accumulator produced in-kernel.
    per_row_bytes = (2 * d_pad * x_itemsize   # x tile (double buffered)
                     + 2 * d_pad * x_itemsize # out tile (double buffered)
                     + 4 * h_pad              # f32 hidden
                     + 4 * d_pad)             # f32 output accumulator

    cap = _vmem_capacity_bytes()
    budget = cap * 3 // 4

    if tm is None:
        tm = _pick_tm(M, per_row_bytes, resident_bytes, budget)
    else:
        tm = _round_up(tm, _SUBLANE)

    # Fused projection weights/biases, zero-padded to lane-aligned shapes
    # (zero rows/cols contribute nothing to the contractions).
    wh = jnp.pad(jnp.concatenate([ws, wp], axis=1),
                 ((0, d_pad - D), (0, h_pad - H)))
    bh = jnp.pad(jnp.concatenate([bs, bp], axis=1), ((0, 0), (0, h_pad - H)))
    wm_p = jnp.pad(wm, ((0, h_pad - H), (0, d_pad - D)))
    bm_p = jnp.pad(bm, ((0, 0), (0, d_pad - D)))

    x2d = x.reshape(M, D)
    if d_pad != D:
        # Feature dim must be zero-padded for a correct lane-dense
        # contraction; since x streams through HBM for that pad anyway, fold
        # the row padding into the same call (keeps every block full).
        m_pad = _round_up(M, tm)
        x2d = jnp.pad(x2d, ((0, m_pad - M), (0, d_pad - D)))
    else:
        # Lane-aligned D: no wrapper-side pad / slice HBM round trip.  A final
        # partial row block is handled by Pallas edge-block masking (rows past
        # M are never written back; garbage rows stay row-local).
        m_pad = M

    grid = (pl.cdiv(m_pad, tm),)

    est_vmem = resident_bytes + tm * per_row_bytes + (2 << 20)
    compiler_kwargs = dict(dimension_semantics=("parallel",))
    if est_vmem > 16 * 1024 * 1024:   # v5e default scoped-VMEM limit ~16 MiB
        compiler_kwargs["vmem_limit_bytes"] = int(min(est_vmem, cap * 7 // 8))

    resident_kwargs = {"pipeline_mode": pl.Buffered(1)} if single_buffer else {}

    def resident(arr):  # full-array block, constant index map -> VMEM-resident
        return pl.BlockSpec(arr.shape, lambda i: (0, 0), **resident_kwargs)

    # Note: for very large production D (d_pad >= ~4096) a second grid axis
    # over output columns (hidden computed once per row tile into scratch)
    # would keep tm large inside v7x's 64 MiB VMEM; not needed at these sizes.
    out2d = pl.pallas_call(
        _transfer_kernel,
        out_shape=jax.ShapeDtypeStruct((m_pad, d_pad), x.dtype),
        grid_spec=pltpu.PrefetchScalarGridSpec(
            num_scalar_prefetch=0,
            grid=grid,
            in_specs=[
                pl.BlockSpec((tm, d_pad), lambda i: (i, 0)),   # x row tile
                resident(wh), resident(bh),
                resident(wm_p), resident(bm_p),
            ],
            out_specs=pl.BlockSpec((tm, d_pad), lambda i: (i, 0)),
        ),
        compiler_params=pltpu.CompilerParams(**compiler_kwargs),
    )(x2d, wh, bh, wm_p, bm_p)

    return out2d[:M, :D].reshape(B, T, D)


def _reference(x, ws, bs, wp, bp, wm, bm):
    shared = jax.nn.relu(x @ ws + bs[0])
    private = jax.nn.relu(x @ wp + bp[0])
    concat = jnp.concatenate([shared, private], axis=-1)
    return concat @ wm + bm[0]


if __name__ == "__main__":
    shared_dim, private_dim = 256, 128   # nn.Module defaults

    key = jax.random.PRNGKey(0)

    def init_linear(kw, kb, fan_in, fan_out):
        bound = 1.0 / jnp.sqrt(fan_in)
        w = jax.random.uniform(kw, (fan_in, fan_out), jnp.float32, -bound, bound)
        b = jax.random.uniform(kb, (1, fan_out), jnp.float32, -bound, bound)
        return w, b

    def run_case(D, B, T, case_key):
        kx, k1, k2, k3, k4, k5, k6 = jax.random.split(case_key, 7)
        ws, bs = init_linear(k1, k2, D, shared_dim)
        wp, bp = init_linear(k3, k4, D, private_dim)
        wm, bm = init_linear(k5, k6, shared_dim + private_dim, D)
        xx = jax.random.normal(kx, (B, T, D), dtype=jnp.float32)
        out = jax.block_until_ready(
            cross_domain_transfer(xx, ws, bs, wp, bp, wm, bm))
        ref = _reference(xx, ws, bs, wp, bp, wm, bm)
        assert out.shape == (B, T, D)
        assert jnp.allclose(out, ref, atol=1e-3, rtol=1e-3), \
            f"mismatch at D={D}, B={B}, T={T}"

    k0, k1, k2, k3 = jax.random.split(key, 4)
    run_case(32, 2, 8, k0)      # module-consistent small shape, one grid step
    run_case(32, 3, 5, k1)      # ragged row count with lane-padded feature dim
    run_case(32, 2, 640, k2)    # multi-step tiled rows (even step count)
    run_case(128, 2, 100, k3)   # lane-aligned D: no pad/slice, partial edge block
    print("KERNEL_OK")
</pallas_src>

<mosaic_0001>
module attributes {stable_mosaic.version = 11 : i64} {
  func.func @_copy(%arg0: i32, %arg1: memref<8x128xf32, #tpu.memory_space<vmem>>, %arg2: memref<8x128xf32, #tpu.memory_space<vmem>>) attributes {dimension_semantics = [#tpu.dimension_semantics<arbitrary>], iteration_bounds = array<i64: 1>, scalar_prefetch = 0 : i64, scratch_operands = 0 : i64, tpu.core_type = #tpu.core_type<tc>, window_params = [{pipeline_mode = #tpu.pipeline_mode<synchronous>, transform_indices = @transform_0, window_bounds = array<i64: 8, 128>}, {pipeline_mode = #tpu.pipeline_mode<synchronous>, transform_indices = @transform_1, window_bounds = array<i64: 8, 128>}]} {
    %c0 = arith.constant 0 : index
    %c0_0 = arith.constant 0 : index
    %0 = vector.load %arg1[%c0, %c0_0] : memref<8x128xf32, #tpu.memory_space<vmem>>, vector<8x128xf32>
    %c0_1 = arith.constant 0 : index
    %c0_2 = arith.constant 0 : index
    %1 = vector.load %arg2[%c0_1, %c0_2] : memref<8x128xf32, #tpu.memory_space<vmem>>, vector<8x128xf32>
    tpu.vector_store %arg2[%c0_1, %c0_2], %0 {strides = array<i32>} : memref<8x128xf32, #tpu.memory_space<vmem>>, vector<8x128xf32>,
    return
  }
  func.func @transform_0(%arg0: i32) -> (i32, i32) {
    %c0_i32 = arith.constant 0 : i32
    %c0_i32_0 = arith.constant 0 : i32
    %c0_i32_1 = arith.constant 0 : i32
    return %c0_i32, %c0_i32_0 : i32, i32
  }
  func.func @transform_1(%arg0: i32) -> (i32, i32) {
    %c0_i32 = arith.constant 0 : i32
    %c0_i32_0 = arith.constant 0 : i32
    %c0_i32_1 = arith.constant 0 : i32
    return %c0_i32, %c0_i32_0 : i32, i32
  }
}

module attributes {stable_mosaic.version = 11 : i64} {
  func.func @_transfer_kernel(%arg0: i32, %arg1: memref<16x128xf32, #tpu.memory_space<vmem>>, %arg2: memref<128x384xf32, #tpu.memory_space<vmem>>, %arg3: memref<1x384xf32, #tpu.memory_space<vmem>>, %arg4: memref<384x128xf32, #tpu.memory_space<vmem>>, %arg5: memref<1x128xf32, #tpu.memory_space<vmem>>, %arg6: memref<16x128xf32, #tpu.memory_space<vmem>>) attributes {dimension_semantics = [#tpu.dimension_semantics<parallel>], iteration_bounds = array<i64: 1>, scalar_prefetch = 0 : i64, scratch_operands = 0 : i64, tpu.core_type = #tpu.core_type<tc>, window_params = [{transform_indices = @transform_0, window_bounds = array<i64: 16, 128>}, {pipeline_mode = #tpu.pipeline_mode<synchronous>, transform_indices = @transform_1, window_bounds = array<i64: 128, 384>}, {pipeline_mode = #tpu.pipeline_mode<synchronous>, transform_indices = @transform_2, window_bounds = array<i64: 1, 384>}, {pipeline_mode = #tpu.pipeline_mode<synchronous>, transform_indices = @transform_3, window_bounds = array<i64: 384, 128>}, {pipeline_mode = #tpu.pipeline_mode<synchronous>, transform_indices = @transform_4, window_bounds = array<i64: 1, 128>}, {transform_indices = @transform_5, window_bounds = array<i64: 16, 128>}]} {
    %c0 = arith.constant 0 : index
    %c0_0 = arith.constant 0 : index
    %0 = vector.load %arg1[%c0, %c0_0] : memref<16x128xf32, #tpu.memory_space<vmem>>, vector<16x128xf32>
    %c0_1 = arith.constant 0 : index
    %c0_2 = arith.constant 0 : index
    %1 = vector.load %arg2[%c0_1, %c0_2] : memref<128x384xf32, #tpu.memory_space<vmem>>, vector<128x384xf32>
    %cst = arith.constant dense<0.000000e+00> : vector<16x384xf32>
    %2 = tpu.matmul %0, %1, %cst {dimension_numbers = #tpu.dot_dimension_numbers<[1], [0], [0], [1], [0, 0, 1, 1], [], []>} : vector<16x128xf32>, vector<128x384xf32>, vector<16x384xf32> -> vector<16x384xf32>
    %c0_3 = arith.constant 0 : index
    %c0_4 = arith.constant 0 : index
    %3 = vector.load %arg3[%c0_3, %c0_4] : memref<1x384xf32, #tpu.memory_space<vmem>>, vector<1x384xf32>
    %4 = vector.broadcast %3 : vector<1x384xf32> to vector<16x384xf32>
    %5 = arith.addf %2, %4 : vector<16x384xf32>
    %cst_5 = arith.constant 0.000000e+00 : f32
    %6 = vector.broadcast %cst_5 : f32 to vector<16x384xf32>
    %7 = arith.maximumf %5, %6 : vector<16x384xf32>
    %c0_6 = arith.constant 0 : index
    %c0_7 = arith.constant 0 : index
    %8 = vector.load %arg4[%c0_6, %c0_7] : memref<384x128xf32, #tpu.memory_space<vmem>>, vector<384x128xf32>
    %cst_8 = arith.constant dense<0.000000e+00> : vector<16x128xf32>
    %9 = tpu.matmul %7, %8, %cst_8 {dimension_numbers = #tpu.dot_dimension_numbers<[1], [0], [0], [1], [0, 0, 1, 1], [], []>} : vector<16x384xf32>, vector<384x128xf32>, vector<16x128xf32> -> vector<16x128xf32>
    %c0_9 = arith.constant 0 : index
    %c0_10 = arith.constant 0 : index
    %10 = vector.load %arg5[%c0_9, %c0_10] : memref<1x128xf32, #tpu.memory_space<vmem>>, vector<1x128xf32>
    %11 = vector.broadcast %10 : vector<1x128xf32> to vector<16x128xf32>
    %12 = arith.addf %9, %11 : vector<16x128xf32>
    %c0_11 = arith.constant 0 : index
    %c0_12 = arith.constant 0 : index
    %13 = vector.load %arg6[%c0_11, %c0_12] : memref<16x128xf32, #tpu.memory_space<vmem>>, vector<16x128xf32>
    tpu.vector_store %arg6[%c0_11, %c0_12], %12 {strides = array<i32>} : memref<16x128xf32, #tpu.memory_space<vmem>>, vector<16x128xf32>,
    return
  }
  func.func @transform_0(%arg0: i32) -> (i32, i32) {
    %c0_i32 = arith.constant 0 : i32
    %c0_i32_0 = arith.constant 0 : i32
    return %arg0, %c0_i32 : i32, i32
  }
  func.func @transform_1(%arg0: i32) -> (i32, i32) {
    %c0_i32 = arith.constant 0 : i32
    %c0_i32_0 = arith.constant 0 : i32
    %c0_i32_1 = arith.constant 0 : i32
    return %c0_i32, %c0_i32_0 : i32, i32
  }
  func.func @transform_2(%arg0: i32) -> (i32, i32) {
    %c0_i32 = arith.constant 0 : i32
    %c0_i32_0 = arith.constant 0 : i32
    %c0_i32_1 = arith.constant 0 : i32
    return %c0_i32, %c0_i32_0 : i32, i32
  }
  func.func @transform_3(%arg0: i32) -> (i32, i32) {
    %c0_i32 = arith.constant 0 : i32
    %c0_i32_0 = arith.constant 0 : i32
    %c0_i32_1 = arith.constant 0 : i32
    return %c0_i32, %c0_i32_0 : i32, i32
  }
  func.func @transform_4(%arg0: i32) -> (i32, i32) {
    %c0_i32 = arith.constant 0 : i32
    %c0_i32_0 = arith.constant 0 : i32
    %c0_i32_1 = arith.constant 0 : i32
    return %c0_i32, %c0_i32_0 : i32, i32
  }
  func.func @transform_5(%arg0: i32) -> (i32, i32) {
    %c0_i32 = arith.constant 0 : i32
    %c0_i32_0 = arith.constant 0 : i32
    return %arg0, %c0_i32 : i32, i32
  }
}

</mosaic_0001>

<bundles_post_ra>
// kernel: tpu_custom_call.1
= control target key start
LH: loop header
LB: loop body
LE: loop exit
PB: predicated region body
PF: predicated region fallthrough
CT: control target
= control target key end

     0   :  { %6 = vsyncpa [#allocation3], 0  ;;  %s124_s0 = inlined_call_operand.hbm [shape: f32[8,128], index: 0, kind: input, shape index: {}]   ;;  %s125_s1 = inlined_call_operand.hbm [shape: f32[8,128], index: 1, kind: output, shape index: {}]  }
   0x1   :  { %7 = vsyncpa [#allocation4], 0  ;;  %s88_s6 = smov [#allocation2]   ;;  %s40_s10 = scalar_lea.hbm %s124_s0, 128 }
   0x2   :  { %s14_s7 = sshll.u32 %s88_s6, 4  ;;  %p41_p0 = scmp.ne.s32.totalorder %s124_s0, %s40_s10  ;;  %s15_s7 = int_to_ptr.vmem [resolvable:$true] %s14_s7 }
   0x3   :  { %p44_p1 = scmp.lt.u32.totalorder %s40_s10, %s124_s0 }
   0x5   :  { %p46_p2 = pnand %p44_p1, %p41_p0 }
   0x7   :  { %49 = shalt.err (!%p46_p2)
}
   0x8   :  { %s50_s15 = scalar_lea.vmem %s15_s7, 128  ;;  %p55_p4 = scmp.lt.s32.totalorder %s15_s7, %s15_s7 }
   0x9   :  { %p51_p3 = scmp.ne.s32.totalorder %s15_s7, %s50_s15  ;;  %p56_p5 = scmp.lt.s32.totalorder %s50_s15, %s50_s15 }
   0xb   :  { %p57_p6 = por %p56_p5, %p55_p4 }
   0xd   :  { %p58_p7 = pnand %p57_p6, %p51_p3 }
   0xf   :  { %61 = shalt.err (!%p58_p7)
}
  0x10   :  { %17 = dma.hbm_to_vmem [thread:$0]  %s124_s0, 128, %s15_s7, [#allocation3]  }
  0x11   :  { %84 = dma.done.wait [#allocation3], 128  }
  0x12   :  { %85 = vsyncadd [#allocation3], 4294967168  ;;  %s89_s18 = smov [#allocation5]   ;;  %v21_v0 = vld [vmem:[#allocation2] sm:$0xff] }
  0x13   :  { %s29_s19 = sshll.u32 %s89_s18, 4  ;;  %22 = vst [vmem:[#allocation5] sm:$0xff] %v21_v0  ;;  %s30_s19 = int_to_ptr.vmem [resolvable:$true] %s29_s19 }
  0x14   :  { %s62_s20 = scalar_lea.vmem %s30_s19, 128  ;;  %p67_p9 = scmp.lt.s32.totalorder %s30_s19, %s30_s19 }
  0x15   :  { %p63_p8 = scmp.ne.s32.totalorder %s30_s19, %s62_s20  ;;  %p68_p10 = scmp.lt.s32.totalorder %s62_s20, %s62_s20 }
  0x17   :  { %p69_p11 = por %p68_p10, %p67_p9 }
  0x19   :  { %p70_p12 = pnand %p69_p11, %p63_p8 }
  0x1b   :  { %73 = shalt.err (!%p70_p12)
}
  0x1c   :  { %s74_s23 = scalar_lea.hbm %s125_s1, 128 }
  0x1d   :  { %p75_p13 = scmp.ne.s32.totalorder %s125_s1, %s74_s23  ;;  %p78_p0 = scmp.lt.u32.totalorder %s74_s23, %s125_s1 }
  0x1f   :  { %p80_p1 = pnand %p78_p0, %p75_p13 }
  0x21   :  { %83 = shalt.err (!%p80_p1)
}
  0x22   :  { %32 = dma.vmem_to_hbm [thread:$0]  %s30_s19, 128, %s125_s1, [#allocation4]  }
  0x23   :  { %86 = dma.done.wait [#allocation4], 128  }
  0x24   :  { %87 = vsyncadd [#allocation4], 4294967168 }
  0x25   :  { %36 = vsyncpa [#allocation3], 1 }
  0x26   :  { %37 = vsyncpa [#allocation4], 1 }

// kernel: tpu_custom_call.1
= control target key start
LH: loop header
LB: loop body
LE: loop exit
PB: predicated region body
PF: predicated region fallthrough
CT: control target
= control target key end

     0   :  { %10 = vsyncpa [#allocation3], 0  ;;  %s996_s0 = inlined_call_operand.hbm [shape: f32[16,128], index: 0, kind: input, shape index: {}]   ;;  %s997_s1 = inlined_call_operand.hbm [shape: f32[128,384], index: 1, kind: input, shape index: {}]   ;;  %s998_s2 = inlined_call_operand.vmem [shape: f32[1,384], index: 2, kind: input, shape index: {}]   ;;  %s999_s3 = inlined_call_operand.hbm [shape: f32[384,128], index: 3, kind: input, shape index: {}]   ;;  %s1000_s4 = inlined_call_operand.vmem [shape: f32[1,128], index: 4, kind: input, shape index: {}]   ;;  %s1001_s5 = inlined_call_operand.hbm [shape: f32[16,128], index: 5, kind: output, shape index: {}]  }
   0x1   :  { %11 = vsyncpa [#allocation6], 0 }
   0x2   :  { %12 = vsyncpa [#allocation4], 0  ;;  %s888_s18 = smov [#allocation5]   ;;  %s794_s22 = scalar_lea.hbm %s997_s1, 6144 }
   0x3   :  { %s30_s19 = sshll.u32 %s888_s18, 4  ;;  %p795_p0 = scmp.ne.s32.totalorder %s997_s1, %s794_s22  ;;  %s31_s19 = int_to_ptr.vmem [resolvable:$true] %s30_s19 }
   0x4   :  { %p798_p1 = scmp.lt.u32.totalorder %s794_s22, %s997_s1 }
   0x6   :  { %p800_p2 = pnand %p798_p1, %p795_p0 }
   0x8   :  { %803 = shalt.err (!%p800_p2)
}
   0x9   :  { %s804_s27 = scalar_lea.vmem %s31_s19, 6144  ;;  %p809_p4 = scmp.lt.s32.totalorder %s31_s19, %s31_s19 }
   0xa   :  { %p805_p3 = scmp.ne.s32.totalorder %s31_s19, %s804_s27  ;;  %p810_p5 = scmp.lt.s32.totalorder %s804_s27, %s804_s27 }
   0xc   :  { %p811_p6 = por %p810_p5, %p809_p4 }
   0xe   :  { %p812_p7 = pnand %p811_p6, %p805_p3 }
  0x10   :  { %815 = shalt.err (!%p812_p7)
}
  0x11   :  { %s889_s28 = smov 384   ;;  %s890_s29 = smov 24  }
  0x12   :  { %36 = dma.hbm_to_vmem [thread:$0]  %s997_s1, 6144, %s31_s19, [#allocation6], %s889_s28, %s889_s28, %s890_s29  }
  0x13   :  { %s891_s7 = smov [#allocation2]   ;;  %s816_s11 = scalar_lea.hbm %s996_s0, 256 }
  0x14   :  { %s18_s8 = sshll.u32 %s891_s7, 4  ;;  %p817_p8 = scmp.ne.s32.totalorder %s996_s0, %s816_s11  ;;  %s19_s8 = int_to_ptr.vmem [resolvable:$true] %s18_s8 }
  0x15   :  { %p820_p9 = scmp.lt.u32.totalorder %s816_s11, %s996_s0 }
  0x17   :  { %p822_p10 = pnand %p820_p9, %p817_p8 }
  0x19   :  { %825 = shalt.err (!%p822_p10)
}
  0x1a   :  { %s826_s16 = scalar_lea.vmem %s19_s8, 256  ;;  %p831_p12 = scmp.lt.s32.totalorder %s19_s8, %s19_s8 }
  0x1b   :  { %p827_p11 = scmp.ne.s32.totalorder %s19_s8, %s826_s16  ;;  %p832_p13 = scmp.lt.s32.totalorder %s826_s16, %s826_s16 }
  0x1d   :  { %p833_p0 = por %p832_p13, %p831_p12 }
  0x1f   :  { %p834_p1 = pnand %p833_p0, %p827_p11 }
  0x21   :  { %837 = shalt.err (!%p834_p1)
}
  0x22   :  { %s892_s1 = smov 128   ;;  %s893_s17 = smov 8  }
  0x23   :  { %24 = dma.hbm_to_vmem [thread:$0]  %s996_s0, 256, %s19_s8, [#allocation3], %s892_s1, %s892_s1, %s893_s17  }
  0x24   :  { %s894_s20 = smov [#allocation7]   ;;  %s838_s24 = scalar_lea.hbm %s999_s3, 6144 }
  0x25   :  { %s44_s21 = sshll.u32 %s894_s20, 4  ;;  %p839_p2 = scmp.ne.s32.totalorder %s999_s3, %s838_s24  ;;  %s45_s21 = int_to_ptr.vmem [resolvable:$true] %s44_s21 }
  0x26   :  { %p842_p3 = scmp.lt.u32.totalorder %s838_s24, %s999_s3 }
  0x28   :  { %p844_p4 = pnand %p842_p3, %p839_p2 }
  0x2a   :  { %847 = shalt.err (!%p844_p4)
}
  0x2b   :  { %s848_s29 = scalar_lea.vmem %s45_s21, 6144  ;;  %p853_p6 = scmp.lt.s32.totalorder %s45_s21, %s45_s21 }
  0x2c   :  { %p849_p5 = scmp.ne.s32.totalorder %s45_s21, %s848_s29  ;;  %p854_p7 = scmp.lt.s32.totalorder %s848_s29, %s848_s29 }
  0x2e   :  { %p855_p8 = por %p854_p7, %p853_p6 }
  0x30   :  { %p856_p9 = pnand %p855_p8, %p849_p5 }
  0x32   :  { %859 = shalt.err (!%p856_p9)
}
  0x33   :  { %50 = dma.hbm_to_vmem [thread:$0]  %s999_s3, 6144, %s45_s21, [#allocation6], %s892_s1, %s892_s1, %s893_s17  }
  0x34   :  { %882 = dma.done.wait [#allocation3], 256  }
  0x35   :  { %883 = vsyncadd [#allocation3], 4294967040 }
  0x36   :  { %884 = dma.done.wait [#allocation6], 12288  }
  0x37   :  { %885 = vsyncadd [#allocation6], 4294955008  ;;  %v895_v0 = vmov 0.0   ;;  %v65_v1 = vld [vmem:[#allocation5 + $0x8] sm:$0xff]  ;;  %v68_v2 = vld [vmem:[#allocation5 + $0x20] sm:$0xff]  ;;  %s896_s8 = smov [#allocation8]  }
  0x38   :  { %193 = vmatprep.mubr.f32.mxu0 %v895_v0  ;;  %v64_v3 = vld [vmem:[#allocation5] sm:$0xff]  ;;  %v657_v4 = vpack.c.bf16 %v68_v2, %v65_v1  ;;  %v67_v5 = vld [vmem:[#allocation5 + $0x18] sm:$0xff]  ;;  %v74_v7 = vld [vmem:[#allocation5 + $0x50] sm:$0xff]  ;;  %s499_s9 = sshll.u32 %s896_s8, 4  ;;  %s500_s9 = int_to_ptr.vmem [resolvable:$true] %s499_s9 }
  0x39   :  { %v71_v6 = vld [vmem:[#allocation5 + $0x38] sm:$0xff]  ;;  %v659_v8 = vpack.c.bf16 %v67_v5, %v64_v3  ;;  %v66_v10 = vld [vmem:[#allocation5 + $0x10] sm:$0xff]  ;;  %v69_v11 = vld [vmem:[#allocation5 + $0x28] sm:$0xff]  ;;  %s860_s10 = scalar_lea.vmem %s500_s9, 256  ;;  %p865_p11 = scmp.lt.s32.totalorder %s500_s9, %s500_s9 }
  0x3a   :  { %v661_v9 = vpack.c.bf16 %v74_v7, %v71_v6  ;;  %v70_v12 = vld [vmem:[#allocation5 + $0x30] sm:$0xff]  ;;  %658 = vmatprep.subr.bf16.mxu0 %v657_v4  ;;  %v689_v13 = vpack.c.bf16 %v69_v11, %v66_v10  ;;  %v73_v14 = vld [vmem:[#allocation5 + $0x48] sm:$0xff]  ;;  %v80_v16 = vld [vmem:[#allocation5 + $0x80] sm:$0xff]  ;;  %p861_p10 = scmp.ne.s32.totalorder %s500_s9, %s860_s10  ;;  %p866_p12 = scmp.lt.s32.totalorder %s860_s10, %s860_s10 }
  0x3b   :  { %v77_v15 = vld [vmem:[#allocation5 + $0x68] sm:$0xff]  ;;  %660 = vmatpush1.bf16.msra.mxu0 %v659_v8  ;;  %v663_v17 = vpack.c.bf16 %v73_v14, %v70_v12  ;;  %v72_v18 = vld [vmem:[#allocation5 + $0x40] sm:$0xff]  ;;  %v75_v19 = vld [vmem:[#allocation5 + $0x58] sm:$0xff] }
  0x3c   :  { %662 = vmatprep.subr.bf16.mxu0 %v661_v9  ;;  %690 = vmatprep.subr.bf16.mxu1 %v689_v13  ;;  %v665_v20 = vpack.c.bf16 %v80_v16, %v77_v15  ;;  %v693_v21 = vpack.c.bf16 %v75_v19, %v72_v18  ;;  %v76_v22 = vld [vmem:[#allocation5 + $0x60] sm:$0xff]  ;;  %v79_v23 = vld [vmem:[#allocation5 + $0x78] sm:$0xff]  ;;  %v86_v25 = vld [vmem:[#allocation5 + $0xb0] sm:$0xff]  ;;  %p867_p13 = por %p866_p12, %p865_p11 }
  0x3d   :  { %v83_v24 = vld [vmem:[#allocation5 + $0x98] sm:$0xff]  ;;  %692 = vmatpush3.bf16.msra.mxu1 %v689_v13  ;;  %v78_v26 = vld [vmem:[#allocation5 + $0x70] sm:$0xff]  ;;  %v81_v27 = vld [vmem:[#allocation5 + $0x88] sm:$0xff]  ;;  %v667_v29 = vpack.c.bf16 %v79_v23, %v76_v22 }
  0x3e   :  { %694 = vmatprep.subr.bf16.mxu1 %v693_v21  ;;  %v697_v28 = vpack.c.bf16 %v81_v27, %v78_v26  ;;  %v84_v30 = vld [vmem:[#allocation5 + $0xa0] sm:$0xff]  ;;  %v87_v31 = vld [vmem:[#allocation5 + $0xb8] sm:$0xff]  ;;  %v669_v32 = vpack.c.bf16 %v86_v25, %v83_v24  ;;  %v82_v33 = vld [vmem:[#allocation5 + $0x90] sm:$0xff]  ;;  %p868_p0 = pnand %p867_p13, %p861_p10 }
  0x3f   :  { %664 = vmatpush1.bf16.msra.mxu0 %v663_v17  ;;  %v85_v34 = vld [vmem:[#allocation5 + $0xa8] sm:$0xff]  ;;  %v92_v36 = vld [vmem:[#allocation5 + $0xe0] sm:$0xff]  ;;  %v701_v37 = vpack.c.bf16 %v87_v31, %v84_v30  ;;  %v90_v39 = vld [vmem:[#allocation5 + $0xd0] sm:$0xff] }
  0x40   :  { %666 = vmatprep.subr.bf16.mxu0 %v665_v20  ;;  %v89_v35 = vld [vmem:[#allocation5 + $0xc8] sm:$0xff]  ;;  %v671_v38 = vpack.c.bf16 %v85_v34, %v82_v33  ;;  %v88_v42 = vld [vmem:[#allocation5 + $0xc0] sm:$0xff]  ;;  %v91_v43 = vld [vmem:[#allocation5 + $0xd8] sm:$0xff] }
  0x41   :  { %696 = vmatpush3.bf16.msra.mxu1 %v693_v21  ;;  %v93_v40 = vld [vmem:[#allocation5 + $0xe8] sm:$0xff]  ;;  %v673_v41 = vpack.c.bf16 %v92_v36, %v89_v35  ;;  %v95_v44 = vld [vmem:[#allocation5 + $0xf8] sm:$0xff]  ;;  %v98_v45 = vld [vmem:[#allocation5 + $0x110] sm:$0xff]  ;;  %v675_v48 = vpack.c.bf16 %v91_v43, %v88_v42 }
  0x42   :  { %698 = vmatprep.subr.bf16.mxu1 %v697_v28  ;;  %v705_v46 = vpack.c.bf16 %v93_v40, %v90_v39  ;;  %v970_v47 = vld [vmem:[#allocation2] sm:$0xff]  ;;  %v96_v49 = vld [vmem:[#allocation5 + $0x100] sm:$0xff]  ;;  %v99_v50 = vld [vmem:[#allocation5 + $0x118] sm:$0xff]  ;;  %v677_v51 = vpack.c.bf16 %v98_v45, %v95_v44 }
  0x43   :  { %668 = vmatpush1.bf16.msra.mxu0 %v667_v29  ;;  %619 = vmatprep.mubr.f32.mxu1 %v970_v47  ;;  %v94_v52 = vld [vmem:[#allocation5 + $0xf0] sm:$0xff]  ;;  %v97_v53 = vld [vmem:[#allocation5 + $0x108] sm:$0xff]  ;;  %v104_v55 = vld [vmem:[#allocation5 + $0x140] sm:$0xff]  ;;  %v709_v56 = vpack.c.bf16 %v99_v50, %v96_v49 }
  0x44   :  { %670 = vmatprep.subr.bf16.mxu0 %v669_v32  ;;  %v101_v54 = vld [vmem:[#allocation5 + $0x128] sm:$0xff]  ;;  %v679_v57 = vpack.c.bf16 %v97_v53, %v94_v52  ;;  %v102_v58 = vld [vmem:[#allocation5 + $0x130] sm:$0xff]  ;;  %v100_v61 = vld [vmem:[#allocation5 + $0x120] sm:$0xff] }
  0x45   :  { %700 = vmatpush3.bf16.msra.mxu1 %v697_v28  ;;  %v105_v59 = vld [vmem:[#allocation5 + $0x148] sm:$0xff]  ;;  %v681_v60 = vpack.c.bf16 %v104_v55, %v101_v54  ;;  %v103_v62 = vld [vmem:[#allocation5 + $0x138] sm:$0xff]  ;;  %v110_v1 = vld [vmem:[#allocation5 + $0x170] sm:$0xff] }
  0x46   :  { %702 = vmatprep.subr.bf16.mxu1 %v701_v37  ;;  %v107_v63 = vld [vmem:[#allocation5 + $0x158] sm:$0xff]  ;;  %v713_v2 = vpack.c.bf16 %v105_v59, %v102_v58  ;;  %v683_v3 = vpack.c.bf16 %v103_v62, %v100_v61  ;;  %v108_v4 = vld [vmem:[#allocation5 + $0x160] sm:$0xff]  ;;  %v106_v7 = vld [vmem:[#allocation5 + $0x150] sm:$0xff] }
  0x47   :  { %672 = vmatpush1.bf16.msra.mxu0 %v671_v38  ;;  %v111_v5 = vld [vmem:[#allocation5 + $0x178] sm:$0xff]  ;;  %v685_v6 = vpack.c.bf16 %v110_v1, %v107_v63  ;;  %v109_v8 = vld [vmem:[#allocation5 + $0x168] sm:$0xff]  ;;  %v303_v9 = vld [vmem:[#allocation7 + $0x80] sm:$0xff] }
  0x48   :  { %674 = vmatprep.subr.bf16.mxu0 %v673_v41  ;;  %v304_v10 = vld [vmem:[#allocation7 + $0x88] sm:$0xff]  ;;  %v717_v11 = vpack.c.bf16 %v111_v5, %v108_v4  ;;  %v687_v12 = vpack.c.bf16 %v109_v8, %v106_v7  ;;  %v319_v13 = vld [vmem:[#allocation7 + $0x100] sm:$0xff]  ;;  %v305_v18 = vld [vmem:[#allocation7 + $0x90] sm:$0xff] }
  0x49   :  { %704 = vmatpush3.bf16.msra.mxu1 %v701_v37  ;;  %v320_v14 = vld [vmem:[#allocation7 + $0x108] sm:$0xff]  ;;  %v721_v15 = vpack.c.bf16 %v304_v10, %v303_v9  ;;  %v287_v16 = vld [vmem:[#allocation7] sm:$0xff]  ;;  %v306_v19 = vld [vmem:[#allocation7 + $0x98] sm:$0xff] }
  0x4a   :  { %706 = vmatprep.subr.bf16.mxu1 %v705_v46  ;;  %v288_v17 = vld [vmem:[#allocation7 + $0x8] sm:$0xff]  ;;  %v753_v20 = vpack.c.bf16 %v320_v14, %v319_v13  ;;  %v321_v22 = vld [vmem:[#allocation7 + $0x110] sm:$0xff]  ;;  %v322_v23 = vld [vmem:[#allocation7 + $0x118] sm:$0xff]  ;;  %v725_v24 = vpack.c.bf16 %v306_v19, %v305_v18 }
  0x4b   :  { %676 = vmatpush1.bf16.msra.mxu0 %v675_v48  ;;  %v723_v21 = vpack.c.bf16 %v288_v17, %v287_v16  ;;  %v289_v25 = vld [vmem:[#allocation7 + $0x10] sm:$0xff]  ;;  %v290_v26 = vld [vmem:[#allocation7 + $0x18] sm:$0xff]  ;;  %v307_v28 = vld [vmem:[#allocation7 + $0xa0] sm:$0xff]  ;;  %v757_v30 = vpack.c.bf16 %v322_v23, %v321_v22 }
  0x4c   :  { %678 = vmatprep.subr.bf16.mxu0 %v677_v51  ;;  %v63_v27 = vld [vmem:[#allocation2 + $0x8] sm:$0xff]  ;;  %v308_v29 = vld [vmem:[#allocation7 + $0xa8] sm:$0xff]  ;;  %v727_v31 = vpack.c.bf16 %v290_v26, %v289_v25  ;;  %v323_v32 = vld [vmem:[#allocation7 + $0x120] sm:$0xff] }
  0x4d   :  { %708 = vmatpush3.bf16.msra.mxu1 %v705_v46  ;;  %v324_v33 = vld [vmem:[#allocation7 + $0x128] sm:$0xff]  ;;  %v729_v34 = vpack.c.bf16 %v308_v29, %v307_v28  ;;  %v291_v35 = vld [vmem:[#allocation7 + $0x20] sm:$0xff]  ;;  %v309_v37 = vld [vmem:[#allocation7 + $0xb0] sm:$0xff] }
  0x4e   :  { %710 = vmatprep.subr.bf16.mxu1 %v709_v56  ;;  %v292_v36 = vld [vmem:[#allocation7 + $0x28] sm:$0xff]  ;;  %v310_v38 = vld [vmem:[#allocation7 + $0xb8] sm:$0xff]  ;;  %v761_v39 = vpack.c.bf16 %v324_v33, %v323_v32  ;;  %v325_v41 = vld [vmem:[#allocation7 + $0x130] sm:$0xff] }
  0x4f   :  { %680 = vmatpush1.bf16.msra.mxu0 %v679_v57  ;;  %v731_v40 = vpack.c.bf16 %v292_v36, %v291_v35  ;;  %v326_v42 = vld [vmem:[#allocation7 + $0x138] sm:$0xff]  ;;  %v293_v43 = vld [vmem:[#allocation7 + $0x30] sm:$0xff]  ;;  %v311_v45 = vld [vmem:[#allocation7 + $0xc0] sm:$0xff] }
  0x50   :  { %682 = vmatprep.subr.bf16.mxu0 %v681_v60  ;;  %v294_v44 = vld [vmem:[#allocation7 + $0x38] sm:$0xff]  ;;  %v312_v46 = vld [vmem:[#allocation7 + $0xc8] sm:$0xff]  ;;  %v327_v49 = vld [vmem:[#allocation7 + $0x140] sm:$0xff] }
  0x51   :  { %712 = vmatpush3.bf16.msra.mxu1 %v709_v56  ;;  %v735_v48 = vpack.c.bf16 %v294_v44, %v293_v43  ;;  %v328_v50 = vld [vmem:[#allocation7 + $0x148] sm:$0xff]  ;;  %v737_v51 = vpack.c.bf16 %v312_v46, %v311_v45  ;;  %v295_v52 = vld [vmem:[#allocation7 + $0x40] sm:$0xff]  ;;  %v313_v54 = vld [vmem:[#allocation7 + $0xd0] sm:$0xff] }
  0x52   :  { %714 = vmatprep.subr.bf16.mxu1 %v713_v2  ;;  %v296_v53 = vld [vmem:[#allocation7 + $0x48] sm:$0xff]  ;;  %v314_v55 = vld [vmem:[#allocation7 + $0xd8] sm:$0xff]  ;;  %v769_v56 = vpack.c.bf16 %v328_v50, %v327_v49  ;;  %v329_v58 = vld [vmem:[#allocation7 + $0x150] sm:$0xff] }
  0x53   :  { %684 = vmatpush1.bf16.msra.mxu0 %v683_v3  ;;  %v739_v57 = vpack.c.bf16 %v296_v53, %v295_v52  ;;  %v330_v59 = vld [vmem:[#allocation7 + $0x158] sm:$0xff]  ;;  %v741_v60 = vpack.c.bf16 %v314_v55, %v313_v54  ;;  %v297_v61 = vld [vmem:[#allocation7 + $0x50] sm:$0xff]  ;;  %v315_v63 = vld [vmem:[#allocation7 + $0xe0] sm:$0xff] }
  0x54   :  { %686 = vmatprep.subr.bf16.mxu0 %v685_v6  ;;  %v298_v62 = vld [vmem:[#allocation7 + $0x58] sm:$0xff]  ;;  %v316_v1 = vld [vmem:[#allocation7 + $0xe8] sm:$0xff]  ;;  %v299_v5 = vld [vmem:[#allocation7 + $0x60] sm:$0xff] }
  0x55   :  { %716 = vmatpush3.bf16.msra.mxu1 %v713_v2  ;;  %v773_v2 = vpack.c.bf16 %v330_v59, %v329_v58  ;;  %v743_v3 = vpack.c.bf16 %v298_v62, %v297_v61  ;;  %v745_v4 = vpack.c.bf16 %v316_v1, %v315_v63  ;;  %v300_v6 = vld [vmem:[#allocation7 + $0x68] sm:$0xff]  ;;  %v317_v8 = vld [vmem:[#allocation7 + $0xf0] sm:$0xff]  ;;  %v318_v9 = vld [vmem:[#allocation7 + $0xf8] sm:$0xff] }
  0x56   :  { %718 = vmatprep.subr.bf16.mxu1 %v717_v11  ;;  %v747_v7 = vpack.c.bf16 %v300_v6, %v299_v5  ;;  %v331_v10 = vld [vmem:[#allocation7 + $0x160] sm:$0xff]  ;;  %v301_v13 = vld [vmem:[#allocation7 + $0x70] sm:$0xff]  ;;  %v302_v14 = vld [vmem:[#allocation7 + $0x78] sm:$0xff] }
  0x57   :  { %688 = vmatpush1.bf16.msra.mxu0 %v687_v12  ;;  %v332_v12 = vld [vmem:[#allocation7 + $0x168] sm:$0xff]  ;;  %v751_v16 = vpack.c.bf16 %v302_v14, %v301_v13  ;;  %v333_v17 = vld [vmem:[#allocation7 + $0x170] sm:$0xff]  ;;  %v334_v18 = vld [vmem:[#allocation7 + $0x178] sm:$0xff] }
  0x58   :  { %722 = vmatprep.subr.bf16.mxu0 %v721_v15  ;;  %v777_v15 = vpack.c.bf16 %v332_v12, %v331_v10  ;;  %v781_v19 = vpack.c.bf16 %v334_v18, %v333_v17  ;;  %v112_v23 = vld [vmem:[%s998_s2] sm:$0x7] }
  0x59   :  { %720 = vmatpush3.bf16.msra.mxu1 %v717_v11  ;;  %v749_v11 = vpack.c.bf16 %v318_v9, %v317_v8 }
  0x5a   :  { %194 = vmatmul.mubr.f32.vlgmr.msra.gmra.mrb[0].mxu0 %v970_v47  ;;  %754 = vmatprep.subr.bf16.mxu1 %v753_v20  ;;  %v765_v47 = vpack.c.bf16 %v326_v42, %v325_v41 }
  0x5b   :  { %199 = vmatprep.mubr.f32.mxu0 %v895_v0  ;;  %724 = vmatpush3.bf16.msra.mxu0 %v723_v21  ;;  %v733_v0 = vpack.c.bf16 %v310_v38, %v309_v37 }
  0x5c   :  { %620 = vmatmul.mubr.f32.vlgmr.msra.gmra.mrb[0].mxu1 %v63_v27  ;;  %726 = vmatprep.subr.bf16.mxu0 %v725_v24 }
  0x5d   :  { %756 = vmatpush3.bf16.msra.mxu1 %v753_v20  ;;  %v114_v20 = vlaneseq }
  0x5e   :  { %200 = vmatmul.mubr.f32.gmra.mrb[2].mxu0 %v63_v27  ;;  %758 = vmatprep.subr.bf16.mxu1 %v757_v30 }
  0x5f   :  { %728 = vmatpush3.bf16.msra.mxu0 %v727_v31  ;;  %v115_v21 = vshrl.u32 %v114_v20, 7 }
  0x60   :  { %730 = vmatprep.subr.bf16.mxu0 %v729_v34 }
  0x61   :  { %760 = vmatpush3.bf16.msra.mxu1 %v757_v30  ;;  %v116_v22 = vsub.s32 0, %v115_v21  ;;  %v120_v24 = vsub.s32 1, %v115_v21  ;;  %v124_v25 = vsub.s32 2, %v115_v21 }
  0x62   :  { %762 = vmatprep.subr.bf16.mxu1 %v761_v39 }
  0x63   :  { %732 = vmatpush3.bf16.msra.mxu0 %v731_v40  ;;  %v117_v26 = vrot.slane %v112_v23, %v116_v22  ;;  %v121_v27 = vrot.slane %v112_v23, %v120_v24  ;;  %v125_v28 = vrot.slane %v112_v23, %v124_v25 }
  0x64   :  { %734 = vmatprep.subr.bf16.mxu0 %v733_v0 }
  0x65   :  { %764 = vmatpush3.bf16.msra.mxu1 %v761_v39 }
  0x66   :  { %766 = vmatprep.subr.bf16.mxu1 %v765_v47 }
  0x67   :  { %736 = vmatpush3.bf16.msra.mxu0 %v735_v48  ;;  %v512_v48 = vld [vmem:[%s1000_s4] ss:$0 sm:$0xff] }
  0x68   :  { %738 = vmatprep.subr.bf16.mxu0 %v737_v51 }
  0x69   :  { %768 = vmatpush3.bf16.msra.mxu1 %v765_v47 }
  0x6a   :  { %770 = vmatprep.subr.bf16.mxu1 %v769_v56 }
  0x6b   :  { %740 = vmatpush3.bf16.msra.mxu0 %v739_v57 }
  0x6c   :  { %742 = vmatprep.subr.bf16.mxu0 %v741_v60 }
  0x6d   :  { %772 = vmatpush3.bf16.msra.mxu1 %v769_v56 }
  0x6e   :  { %774 = vmatprep.subr.bf16.mxu1 %v773_v2 }
  0x6f   :  { %744 = vmatpush3.bf16.msra.mxu0 %v743_v3 }
  0x70   :  { %746 = vmatprep.subr.bf16.mxu0 %v745_v4 }
  0x71   :  { %776 = vmatpush3.bf16.msra.mxu1 %v773_v2 }
  0x72   :  { %778 = vmatprep.subr.bf16.mxu1 %v777_v15 }
  0x73   :  { %748 = vmatpush3.bf16.msra.mxu0 %v747_v7 }
  0x74   :  { %750 = vmatprep.subr.bf16.mxu0 %v749_v11 }
  0x75   :  { %780 = vmatpush3.bf16.msra.mxu1 %v777_v15 }
  0x76   :  { %782 = vmatprep.subr.bf16.mxu1 %v781_v19 }
  0x77   :  { %752 = vmatpush3.bf16.msra.mxu0 %v751_v16 }
  0x79   :  { %784 = vmatpush3.bf16.msra.mxu1 %v781_v19 }
 0x12d   :  { %v195_v29 = vpop.f32.mrb[0].mxu0 }
 0x12e   :  { %v196_v30 = vadd.f32 %v195_v29, %v117_v26  ;;  %v197_v31 = vpop.f32.mrb[1].mxu0 }
 0x12f   :  { %v198_v32 = vadd.f32 %v197_v31, %v121_v27  ;;  %v621_v33 = vpop.f32.mrb[0].mxu1 }
 0x130   :  { %v278_v34 = vadd.f32 %v621_v33, %v125_v28  ;;  %v272_v35 = vpop.f32.mrb[1].mxu1  ;;  %v281_v39 = vmax.f32 %v196_v30, 0.0 }
 0x131   :  { %v282_v36 = vmax.f32 %v198_v32, 0.0  ;;  %v201_v37 = vpop.f32.mrb[2].mxu0  ;;  %v273_v38 = vadd.f32 %v272_v35, %v125_v28 }
 0x132   :  { %v202_v40 = vadd.f32 %v201_v37, %v117_v26  ;;  %v286_v41 = vmax.f32 %v278_v34, 0.0  ;;  %v203_v42 = vpop.f32.mrb[3].mxu0 }
 0x133   :  { %v204_v0 = vadd.f32 %v203_v42, %v121_v27  ;;  %v283_v43 = vmax.f32 %v273_v38, 0.0  ;;  %406 = vmatprep.mubr.f32.mxu0 %v282_v36 }
 0x134   :  { %407 = vmatmul.mubr.f32.vlgmr.msra.gmra.mrb[4].mxu0 %v281_v39  ;;  %v284_v45 = vmax.f32 %v202_v40, 0.0 }
 0x135   :  { %v285_v44 = vmax.f32 %v204_v0, 0.0  ;;  %654 = vmatprep.mubr.f32.mxu1 %v283_v43 }
 0x136   :  { %655 = vmatmul.mubr.f32.vlgmr.msra.gmra.mrb[2].mxu1 %v286_v41 }
 0x137   :  { %411 = vmatprep.mubr.f32.mxu0 %v285_v44 }
 0x138   :  { %412 = vmatmul.mubr.f32.gmra.mrb[6].mxu0 %v284_v45 }
 0x207   :  { %v563_v46 = vpop.f32.mrb[4].mxu0 }
 0x208   :  { %v564_v47 = vpop.f32.mrb[5].mxu0 }
 0x209   :  { %v565_v49 = vadd.f32 %v564_v47, %v563_v46  ;;  %v656_v50 = vpop.f32.mrb[2].mxu1 }
 0x20a   :  { %v483_v51 = vpop.f32.mrb[3].mxu1 }
 0x20b   :  { %v566_v52 = vpop.f32.mrb[6].mxu0  ;;  %v409_v53 = vadd.f32 %v565_v49, %v512_v48 }
 0x20c   :  { %v567_v54 = vpop.f32.mrb[7].mxu0 }
 0x20d   :  { %v568_v55 = vadd.f32 %v567_v54, %v566_v52  ;;  %v484_v56 = vadd.f32 %v483_v51, %v409_v53 }
 0x20f   :  { %v414_v57 = vadd.f32 %v568_v55, %v512_v48  ;;  %492 = vst [vmem:[#allocation8] sm:$0xff] %v484_v56 }
 0x211   :  { %v489_v58 = vadd.f32 %v656_v50, %v414_v57 }
 0x213   :  { %493 = vst [vmem:[#allocation8 + $0x8] sm:$0xff] %v489_v58 }
 0x214   :  { %871 = shalt.err (!%p868_p0)
}
 0x215   :  { %s872_s12 = scalar_lea.hbm %s1001_s5, 256 }
 0x216   :  { %p873_p1 = scmp.ne.s32.totalorder %s1001_s5, %s872_s12  ;;  %p876_p2 = scmp.lt.u32.totalorder %s872_s12, %s1001_s5 }
 0x218   :  { %p878_p3 = pnand %p876_p2, %p873_p1 }
 0x21a   :  { %881 = shalt.err (!%p878_p3)
}
 0x21b   :  { %505 = dma.vmem_to_hbm [thread:$0]  %s500_s9, 256, %s1001_s5, [#allocation4], %s892_s1, %s892_s1, %s893_s17  }
 0x21c   :  { %886 = dma.done.wait [#allocation4], 256  }
 0x21d   :  { %887 = vsyncadd [#allocation4], 4294967040 }
 0x21e   :  { %509 = vsyncpa [#allocation3], 1 }
 0x21f   :  { %510 = vsyncpa [#allocation6], 1 }
 0x220   :  { %511 = vsyncpa [#allocation4], 1 }

</bundles_post_ra>
